<compile_context>
chip_gen: v7x
topology: tpu7x:2x2x1
jax: 0.10.0
libtpu: 0.0.40
codegen_flags: <defaults>
</compile_context>

<pallas_src>
import functools
import math

import jax
import jax.numpy as jnp
from jax import lax
from jax.experimental import pallas as pl
from jax.experimental.pallas import tpu as pltpu


_VMEM_BUDGET_BYTES = 12 * 1024 * 1024  # under v5e's 16 MiB default scoped VMEM


def _sublane_multiple(dtype):
    itemsize = jnp.dtype(dtype).itemsize
    return 8 * max(1, 4 // itemsize)     # 8 for f32, 16 for bf16, 32 for int8


def _choose_row_tile(rows, bytes_per_row, dtype, *, live_blocks, min_tiles=1,
                     budget_bytes=_VMEM_BUDGET_BYTES):
    """Largest divisor-of-rows tile whose `live_blocks` copies fit the budget."""
    sub = _sublane_multiple(dtype)
    max_rows = max(1, budget_bytes // (live_blocks * max(1, bytes_per_row)))
    if min_tiles > 1:
        # Guarantee >= min_tiles grid steps along this axis (feeds v7x's 2 TCs).
        max_rows = min(max_rows, max(1, rows // min_tiles))
    if rows <= max_rows:
        return rows
    fallback = 1
    for d in range(max_rows, 0, -1):
        if rows % d:
            continue
        if d % sub == 0:
            return d                      # sublane-aligned and within budget
        if fallback == 1:
            fallback = d                  # within budget, not sublane-aligned
    return fallback                        # never exceeds the VMEM budget


# ---------------------------------------------------------------------------
# PhaseShuffle kernel (pure data movement, memory-bound)
# ---------------------------------------------------------------------------
def _phase_shuffle_kernel(k_ref, x_ref, o_ref, *, shift_factor):
    # k_ref: (B,) int32 in SMEM (scalar prefetch)
    # x_ref/o_ref: (1, tile_c, T) VMEM blocks, lane-dense along T.
    T = x_ref.shape[-1]
    sf = shift_factor
    b = pl.program_id(0)
    k = k_ref[b]                      # scalar read before any vector work
    kmod = (k + T) % T                # non-negative rotate amount in [0, T)

    # Interior: out[:, t] = x[:, t - k] is a pure lane rotation (XLU slot).
    o_ref[0] = pltpu.roll(x_ref[0], kmod, 1)

    # Reflected left edge (k > 0): out[:, t] = x[:, k - t] for t < k.
    # At most `sf` static columns; each fix is a (tile_c, 1) load + store.
    for t in range(min(sf, T)):
        @pl.when(k > t)
        def _(t=t):
            val = x_ref[0, :, 1:2]                              # src == 1
            for j in range(2, sf - t + 1):                      # src == j
                val = jnp.where(k - t == j, x_ref[0, :, j:j + 1], val)
            o_ref[0, :, t:t + 1] = val

    # Reflected right edge (k < 0): out[:, t] = x[:, 2*(T-1) - t + k] for t >= T + k.
    for t in range(max(T - sf, 0), T):
        @pl.when(k < t - T + 1)
        def _(t=t):
            base = 2 * (T - 1) - t
            val = x_ref[0, :, base - sf:base - sf + 1]          # k == -sf
            for kk in range(-sf + 1, t - T + 1):                # k == kk
                val = jnp.where(k == kk, x_ref[0, :, base + kk:base + kk + 1], val)
            o_ref[0, :, t:t + 1] = val


def phase_shuffle(x, k_list, shift_factor):
    """x: (B, C, T); k_list: (B,) int32 shifts in [-shift_factor, shift_factor]."""
    B, C, T = x.shape
    if shift_factor == 0:
        return x
    assert 0 < shift_factor < T, "single-reflection assumption: |k| <= shift_factor < T"

    itemsize = jnp.dtype(x.dtype).itemsize
    # ~6 live block-sized slabs: 2x double-buffered input, 2x output, ~2 in-kernel.
    tile_c = _choose_row_tile(C, T * itemsize, x.dtype, live_blocks=6,
                              min_tiles=2 if B < 2 else 1)
    grid = (B, C // tile_c)

    kernel = functools.partial(_phase_shuffle_kernel, shift_factor=shift_factor)
    grid_spec = pltpu.PrefetchScalarGridSpec(
        num_scalar_prefetch=1,
        grid=grid,
        in_specs=[pl.BlockSpec((1, tile_c, T), lambda b, c, k: (b, c, 0))],
        out_specs=pl.BlockSpec((1, tile_c, T), lambda b, c, k: (b, c, 0)),
    )
    return pl.pallas_call(
        kernel,
        out_shape=jax.ShapeDtypeStruct((B, C, T), x.dtype),
        grid_spec=grid_spec,
        compiler_params=pltpu.CompilerParams(
            dimension_semantics=("parallel", "parallel")),
    )(jnp.asarray(k_list, jnp.int32), x)


# ---------------------------------------------------------------------------
# print_output: identity.  Optional Pallas copy kernel kept for demonstration.
# ---------------------------------------------------------------------------
def _copy_kernel(x_ref, o_ref):
    o_ref[...] = x_ref[...]


def pallas_identity(x):
    """Identity as a lane-dense tiled Pallas copy (opt-in; costs one HBM R+W)."""
    orig_shape = x.shape
    if x.ndim == 0:
        x2 = x.reshape(1, 1)
    elif x.ndim == 1:
        x2 = x.reshape(1, orig_shape[0])
    else:
        x2 = x.reshape(int(math.prod(orig_shape[:-1])), orig_shape[-1])
    rows, last = x2.shape
    tile_r = _choose_row_tile(rows, last * jnp.dtype(x.dtype).itemsize, x.dtype,
                              live_blocks=4)
    out = pl.pallas_call(
        _copy_kernel,
        out_shape=jax.ShapeDtypeStruct((rows, last), x.dtype),
        grid=(rows // tile_r,),
        in_specs=[pl.BlockSpec((tile_r, last), lambda i: (i, 0))],
        out_specs=pl.BlockSpec((tile_r, last), lambda i: (i, 0)),
        compiler_params=pltpu.CompilerParams(dimension_semantics=("parallel",)),
    )(x2)
    return out.reshape(orig_shape)


class PrintOutput:
    """JAX port of the PyTorch `print_output` module (identity + optional print)."""

    def __init__(self, text, inc_value, print_flag, materialize=False):
        self.text = text
        self.inc_value = inc_value
        self.print_flag = print_flag
        self.materialize = materialize   # opt-in explicit copy kernel

    def __call__(self, x):
        if self.print_flag:
            # TODO(synk): shapes are static in JAX, so this fires once per trace
            # (host-side) rather than once per forward call as in PyTorch.
            print(f"{self.text}: {tuple(x.shape)}")
        if self.materialize:
            return pallas_identity(x)
        return x                          # identity: zero HBM traffic


class PhaseShuffle:
    """JAX/Pallas port of the PyTorch PhaseShuffle module (same WaveGAN_512.py file)."""

    def __init__(self, shift_factor):
        self.shift_factor = shift_factor

    def __call__(self, x, key):
        if self.shift_factor == 0:
            return x
        B = x.shape[0]
        # Matches torch .random_(0, 2*sf+1) - sf  => uniform ints in [-sf, sf]
        k_list = jax.random.randint(
            key, (B,), 0, 2 * self.shift_factor + 1, dtype=jnp.int32
        ) - self.shift_factor
        return phase_shuffle(x, k_list, self.shift_factor)


def _reference_phase_shuffle(x, k_list):
    """Pure-JAX reference replicating the PyTorch reflect-pad semantics."""
    B, C, T = x.shape
    outs = []
    for b in range(B):
        k = int(k_list[b])
        src = jnp.arange(T) - k
        src = jnp.where(src < 0, -src, src)
        src = jnp.where(src > T - 1, 2 * (T - 1) - src, src)
        outs.append(x[b][:, src])
    return jnp.stack(outs, axis=0)


if __name__ == "__main__":
    key = jax.random.PRNGKey(0)
    kx, kk = jax.random.split(key)

    B, C, T = 2, 8, 128
    shift_factor = 2
    x = jax.random.normal(kx, (B, C, T), dtype=jnp.float32)

    # 1) the spec module `print_output`: identity pass-through (print disabled).
    printer = PrintOutput("print_output", 1, False)
    y = printer(x)
    assert y.shape == x.shape and bool(jnp.array_equal(y, x))

    # Opt-in explicit copy kernel (the literal Pallas translation of the module).
    y2 = jax.block_until_ready(pallas_identity(x))
    assert bool(jnp.array_equal(y2, x)), "identity copy mismatch"

    # 2) PhaseShuffle kernel with random shifts (as used in WaveGAN's forward).
    k_list = jax.random.randint(
        kk, (B,), 0, 2 * shift_factor + 1, dtype=jnp.int32) - shift_factor
    out = jax.block_until_ready(phase_shuffle(x, k_list, shift_factor))
    ref = _reference_phase_shuffle(x, jax.device_get(k_list))
    assert out.shape == x.shape
    assert bool(jnp.array_equal(out, ref)), "phase shuffle mismatch vs reference"

    # 3) Exhaustive shift check: every k in [-sf, sf] exercised deterministically.
    x5 = jax.random.normal(jax.random.PRNGKey(1), (5, C, T), dtype=jnp.float32)
    k5 = jnp.array([-2, -1, 0, 1, 2], dtype=jnp.int32)
    out5 = jax.block_until_ready(phase_shuffle(x5, k5, shift_factor))
    ref5 = _reference_phase_shuffle(x5, jax.device_get(k5))
    assert bool(jnp.array_equal(out5, ref5)), "phase shuffle mismatch (exhaustive k)"

    print("KERNEL_OK")
</pallas_src>

<mosaic_0001>
module attributes {stable_mosaic.version = 11 : i64} {
  func.func @_copy_kernel(%arg0: i32, %arg1: memref<16x128xf32, #tpu.memory_space<vmem>>, %arg2: memref<16x128xf32, #tpu.memory_space<vmem>>) attributes {dimension_semantics = [#tpu.dimension_semantics<parallel>], iteration_bounds = array<i64: 1>, scalar_prefetch = 0 : i64, scratch_operands = 0 : i64, tpu.core_type = #tpu.core_type<tc>, window_params = [{transform_indices = @transform_0, window_bounds = array<i64: 16, 128>}, {transform_indices = @transform_1, window_bounds = array<i64: 16, 128>}]} {
    %c0 = arith.constant 0 : index
    %c0_0 = arith.constant 0 : index
    %0 = vector.load %arg1[%c0, %c0_0] : memref<16x128xf32, #tpu.memory_space<vmem>>, vector<16x128xf32>
    %c0_1 = arith.constant 0 : index
    %c0_2 = arith.constant 0 : index
    %1 = vector.load %arg2[%c0_1, %c0_2] : memref<16x128xf32, #tpu.memory_space<vmem>>, vector<16x128xf32>
    tpu.vector_store %arg2[%c0_1, %c0_2], %0 {strides = array<i32>} : memref<16x128xf32, #tpu.memory_space<vmem>>, vector<16x128xf32>,
    return
  }
  func.func @transform_0(%arg0: i32) -> (i32, i32) {
    %c0_i32 = arith.constant 0 : i32
    %c0_i32_0 = arith.constant 0 : i32
    return %arg0, %c0_i32 : i32, i32
  }
  func.func @transform_1(%arg0: i32) -> (i32, i32) {
    %c0_i32 = arith.constant 0 : i32
    %c0_i32_0 = arith.constant 0 : i32
    return %arg0, %c0_i32 : i32, i32
  }
}

</mosaic_0001>

<bundles_post_ra>
// kernel: tpu_custom_call.1
= control target key start
LH: loop header
LB: loop body
LE: loop exit
PB: predicated region body
PF: predicated region fallthrough
CT: control target
= control target key end

     0   :  { %6 = vsyncpa [#allocation3], 0  ;;  %s134_s0 = inlined_call_operand.hbm [shape: f32[16,128], index: 0, kind: input, shape index: {}]   ;;  %s135_s1 = inlined_call_operand.hbm [shape: f32[16,128], index: 1, kind: output, shape index: {}]  }
   0x1   :  { %7 = vsyncpa [#allocation4], 0  ;;  %s96_s6 = smov [#allocation2]   ;;  %s48_s10 = scalar_lea.hbm %s134_s0, 256 }
   0x2   :  { %s13_s7 = sshll.u32 %s96_s6, 4  ;;  %p49_p0 = scmp.ne.s32.totalorder %s134_s0, %s48_s10  ;;  %s14_s7 = int_to_ptr.vmem [resolvable:$true] %s13_s7 }
   0x3   :  { %p52_p1 = scmp.lt.u32.totalorder %s48_s10, %s134_s0 }
   0x5   :  { %p54_p2 = pnand %p52_p1, %p49_p0 }
   0x7   :  { %57 = shalt.err (!%p54_p2)
}
   0x8   :  { %s58_s15 = scalar_lea.vmem %s14_s7, 256  ;;  %p63_p4 = scmp.lt.s32.totalorder %s14_s7, %s14_s7 }
   0x9   :  { %p59_p3 = scmp.ne.s32.totalorder %s14_s7, %s58_s15  ;;  %p64_p5 = scmp.lt.s32.totalorder %s58_s15, %s58_s15 }
   0xb   :  { %p65_p6 = por %p64_p5, %p63_p4 }
   0xd   :  { %p66_p7 = pnand %p65_p6, %p59_p3 }
   0xf   :  { %69 = shalt.err (!%p66_p7)
}
  0x10   :  { %s97_s16 = smov 128   ;;  %s98_s17 = smov 8  }
  0x11   :  { %19 = dma.hbm_to_vmem [thread:$0]  %s134_s0, 256, %s14_s7, [#allocation3], %s97_s16, %s97_s16, %s98_s17  }
  0x12   :  { %92 = dma.done.wait [#allocation3], 256  }
  0x13   :  { %93 = vsyncadd [#allocation3], 4294967040  ;;  %s99_s20 = smov [#allocation5]   ;;  %v23_v0 = vld [vmem:[#allocation2] sm:$0xff]  ;;  %v24_v1 = vld [vmem:[#allocation2 + $0x8] sm:$0xff] }
  0x14   :  { %s32_s21 = sshll.u32 %s99_s20, 4  ;;  %25 = vst [vmem:[#allocation5] sm:$0xff] %v23_v0  ;;  %26 = vst [vmem:[#allocation5 + $0x8] sm:$0xff] %v24_v1  ;;  %s33_s21 = int_to_ptr.vmem [resolvable:$true] %s32_s21 }
  0x15   :  { %s70_s22 = scalar_lea.vmem %s33_s21, 256  ;;  %p75_p9 = scmp.lt.s32.totalorder %s33_s21, %s33_s21 }
  0x16   :  { %p71_p8 = scmp.ne.s32.totalorder %s33_s21, %s70_s22  ;;  %p76_p10 = scmp.lt.s32.totalorder %s70_s22, %s70_s22 }
  0x18   :  { %p77_p11 = por %p76_p10, %p75_p9 }
  0x1a   :  { %p78_p12 = pnand %p77_p11, %p71_p8 }
  0x1c   :  { %81 = shalt.err (!%p78_p12)
}
  0x1d   :  { %s82_s0 = scalar_lea.hbm %s135_s1, 256 }
  0x1e   :  { %p83_p13 = scmp.ne.s32.totalorder %s135_s1, %s82_s0  ;;  %p86_p0 = scmp.lt.u32.totalorder %s82_s0, %s135_s1 }
  0x20   :  { %p88_p1 = pnand %p86_p0, %p83_p13 }
  0x22   :  { %91 = shalt.err (!%p88_p1)
}
  0x23   :  { %38 = dma.vmem_to_hbm [thread:$0]  %s33_s21, 256, %s135_s1, [#allocation4], %s97_s16, %s97_s16, %s98_s17  }
  0x24   :  { %94 = dma.done.wait [#allocation4], 256  }
  0x25   :  { %95 = vsyncadd [#allocation4], 4294967040 }
  0x26   :  { %42 = vsyncpa [#allocation3], 1 }
  0x27   :  { %43 = vsyncpa [#allocation4], 1 }

</bundles_post_ra>
